<compile_context>
chip_gen: v5e
topology: v5e:2x2
jax: 0.10.0
libtpu: 0.0.40
codegen_flags: <defaults>
</compile_context>

<pallas_src>
import functools

import jax
import jax.numpy as jnp
from jax.experimental import pallas as pl
from jax.experimental.pallas import tpu as pltpu


_MAX_TB = 2048  # past this, the ~0.35us per-grid-step overhead is fully amortized


def _round_up(x, m):
    return ((x + m - 1) // m) * m


def _bias_layout(h0, h1, h2, out):
    """128-lane-aligned segment offsets inside the fused (1, total) bias row."""
    o0 = 0
    o1 = o0 + _round_up(h0, 128)
    o2 = o1 + _round_up(h1, 128)
    o3 = o2 + _round_up(h2, 128)
    return o0, o1, o2, o3, o3 + _round_up(out, 128)


# --------------------------------------------------------------------------- #
# Kernel
# --------------------------------------------------------------------------- #
def _mlp_kernel(x_ref, w0_ref, w1_ref, w2_ref, w3_ref, b_ref, o_ref):
    """Fused 4-layer MLP on one batch tile.

    * x arrives f32 and is cast to bf16 HERE (VPU cast hides under the MXU).
    * Weights are pre-cast bf16 (cached outside the hot path); all four layers
      stay fully VMEM-resident -> no K-tiling.
    * Accumulation / bias-add / ReLU in f32 (v5e VPU has no bf16); activations
      drop back to bf16 only as the next matmul's input.
    * All biases live in one 128-aligned fused f32 row (static slices below).
    """
    h0 = w0_ref.shape[1]
    h1 = w1_ref.shape[1]
    h2 = w2_ref.shape[1]
    op = w3_ref.shape[1]
    o0, o1, o2, o3, _ = _bias_layout(h0, h1, h2, op)

    x = x_ref[...].astype(jnp.bfloat16)

    h = jnp.dot(x, w0_ref[...], preferred_element_type=jnp.float32)
    h = jnp.maximum(h + b_ref[:, o0:o0 + h0], 0.0).astype(jnp.bfloat16)

    h = jnp.dot(h, w1_ref[...], preferred_element_type=jnp.float32)
    h = jnp.maximum(h + b_ref[:, o1:o1 + h1], 0.0).astype(jnp.bfloat16)

    h = jnp.dot(h, w2_ref[...], preferred_element_type=jnp.float32)
    h = jnp.maximum(h + b_ref[:, o2:o2 + h2], 0.0).astype(jnp.bfloat16)

    y = jnp.dot(h, w3_ref[...], preferred_element_type=jnp.float32)
    o_ref[...] = (y + b_ref[:, o3:o3 + op]).astype(o_ref.dtype)


# --------------------------------------------------------------------------- #
# Generation-aware tiling policy
# --------------------------------------------------------------------------- #
@functools.lru_cache(maxsize=1)
def _tpu_topology():
    """(vmem_capacity_bytes, tensorcores_per_chip) — best effort, safe fallbacks."""
    vmem = 64 * 1024 * 1024            # v7x-conservative default
    cores = 1
    try:
        info = pltpu.get_tpu_info()
        vmem = int(getattr(info, "vmem_capacity_bytes", vmem))
        for attr in ("num_cores", "num_tensorcores", "tensorcores_per_chip"):
            val = getattr(info, attr, None)
            if isinstance(val, int) and val > 0:
                cores = val
                break
    except Exception:
        pass
    if cores == 1:
        try:
            kind = jax.devices()[0].device_kind.lower()
        except Exception:
            kind = ""
        # Chips whose two TensorCores share the 'parallel' grid axis.
        if any(tag in kind for tag in ("v4", "v5p", "v7", "7x")):
            cores = 2
    return vmem, cores


def _vmem_estimate_bytes(tb, dims):
    """Per-grid-step VMEM footprint with (sublane, lane) tile padding.

    Every VMEM tile pads its last dim to 128 lanes and its second-to-last dim
    to 8 (f32) / 16 (bf16) sublanes — this dominates for skinny operands
    (F=32, H=64, O=4).  Pipeline inputs/outputs and the grid-invariant
    weight/bias blocks are double-buffered; intermediates counted once each.
    """
    F, h0, h1, h2, out_pad = dims

    def tile(rows, cols, itemsize, sublane):
        return _round_up(max(rows, 1), sublane) * _round_up(cols, 128) * itemsize

    bf16 = lambda r, c: tile(r, c, 2, 16)
    f32 = lambda r, c: tile(r, c, 4, 8)

    weights = bf16(F, h0) + bf16(h0, h1) + bf16(h1, h2) + bf16(h2, out_pad)
    biases = f32(1, _bias_layout(h0, h1, h2, out_pad)[-1])
    io = f32(tb, F) + f32(tb, out_pad)                  # f32 x tile + f32 out tile
    inter = (f32(tb, h0) + f32(tb, h1) + f32(tb, h2) + f32(tb, out_pad)
             + bf16(tb, F) + bf16(tb, h0) + bf16(tb, h1) + bf16(tb, h2))
    return 2 * (weights + biases + io) + inter


def _choose_tb(B, max_tb, num_cores):
    """Pick the batch tile size.

    Single-TC chips (v5e/v6e): one tile for the whole batch whenever it fits
    the VMEM budget (extra grid steps only add ~0.35us bookkeeping each).
    Dual-TC chips (v4/v5p/v7x): an EVEN number of tiles so both TensorCores
    sharing the 'parallel' axis get equal work, preferring a tile size that
    divides B exactly (avoids the jnp.pad copy of x).
    """
    max_tb = max(8, (max_tb // 8) * 8)
    if B <= max_tb and (num_cores <= 1 or B <= 256):
        return B
    hi = B if num_cores <= 1 else (B + 1) // 2
    hi = max(8, (min(max_tb, hi) // 8) * 8)
    lo = max(128, hi // 2)              # reject divisors that would double steps
    for cand in range(hi, lo - 1, -8):
        if B % cand == 0 and (num_cores <= 1 or (B // cand) % 2 == 0):
            return cand
    # No suitable exact divisor: pad the batch (rare); keep even steps on 2-TC.
    steps = pl.cdiv(B, hi)
    if num_cores > 1 and steps % 2:
        steps += 1
    return min(hi, _round_up(pl.cdiv(B, steps), 8))


# --------------------------------------------------------------------------- #
# Parameter preparation (one-time, outside the hot path)
# --------------------------------------------------------------------------- #
def prepare_params(params):
    """Convert f32 ([in,out] weight, bias) pairs into the kernel's cached form.

    bf16 weight cast, lane-dense (128-multiple) padding of the last layer, and
    fusion of the four biases into a single 128-aligned f32 row — paid ONCE.
    """
    (w0, b0), (w1, b1), (w2, b2), (w3, b3) = params
    n_out = w3.shape[1]
    out_pad = _round_up(n_out, 128)
    if out_pad != n_out:
        w3 = jnp.pad(w3, ((0, 0), (0, out_pad - n_out)))
        b3 = jnp.pad(b3, ((0, out_pad - n_out),))

    h0, h1, h2 = w0.shape[1], w1.shape[1], w2.shape[1]
    o0, o1, o2, o3, total = _bias_layout(h0, h1, h2, out_pad)
    b_all = jnp.zeros((1, total), jnp.float32)
    b_all = b_all.at[0, o0:o0 + h0].set(b0.astype(jnp.float32))
    b_all = b_all.at[0, o1:o1 + h1].set(b1.astype(jnp.float32))
    b_all = b_all.at[0, o2:o2 + h2].set(b2.astype(jnp.float32))
    b_all = b_all.at[0, o3:o3 + out_pad].set(b3.astype(jnp.float32))

    weights = tuple(w.astype(jnp.bfloat16) for w in (w0, w1, w2, w3))
    return {"weights": weights, "bias": b_all, "n_output": n_out}


# --------------------------------------------------------------------------- #
# Forward wrapper (hot path: exactly one kernel launch)
# --------------------------------------------------------------------------- #
def my_mlp_forward(x, prepared, *, tb=None):
    """MyMLP forward. x: [B, n_feature] f32 -> [B, n_output] f32."""
    w0, w1, w2, w3 = prepared["weights"]
    b_all = prepared["bias"]
    n_out = prepared["n_output"]
    B, F = x.shape
    out_pad = w3.shape[1]
    dims = (F, w0.shape[1], w1.shape[1], w2.shape[1], out_pad)

    vmem_cap, num_cores = _tpu_topology()
    budget = min(max(int(0.70 * vmem_cap), 24 << 20), 100 << 20)
    vmem_limit = min(max(int(0.80 * vmem_cap), 32 << 20), 112 << 20)

    if tb is None:
        max_tb = _MAX_TB
        while max_tb > 128 and _vmem_estimate_bytes(max_tb, dims) > budget:
            max_tb //= 2
        tb = _choose_tb(B, max_tb, num_cores)

    num_tiles = pl.cdiv(B, tb)
    Bp = num_tiles * tb
    # Common path: tb divides B (no padded copy). Ragged fallback pads x once.
    x_in = x if Bp == B else jnp.pad(x, ((0, Bp - B), (0, 0)))

    def full(arr):
        # Grid-invariant block: whole array, same block index every step (the
        # pipeline fetches it once and reuses the VMEM buffer).
        return pl.BlockSpec(arr.shape, lambda i: (0, 0))

    out = pl.pallas_call(
        _mlp_kernel,
        out_shape=jax.ShapeDtypeStruct((Bp, out_pad), jnp.float32),
        grid_spec=pltpu.PrefetchScalarGridSpec(
            num_scalar_prefetch=0,
            grid=(num_tiles,),
            in_specs=[
                pl.BlockSpec((tb, F), lambda i: (i, 0)),   # f32 x tile
                full(w0), full(w1), full(w2), full(w3),    # bf16 weights
                full(b_all),                               # fused f32 biases
            ],
            out_specs=pl.BlockSpec((tb, out_pad), lambda i: (i, 0)),
        ),
        compiler_params=pltpu.CompilerParams(
            dimension_semantics=("parallel",),
            vmem_limit_bytes=vmem_limit),
    )(x_in, w0, w1, w2, w3, b_all)

    if Bp != B or out_pad != n_out:
        out = out[:B, :n_out]
    return out


# --------------------------------------------------------------------------- #
# Init + reference
# --------------------------------------------------------------------------- #
def init_params(key, n_feature, n_hidden, n_output):
    """Deterministic init mimicking PyTorch Linear default U(-1/sqrt(fan_in), .)."""
    dims = [(n_feature, n_hidden), (n_hidden, 512), (512, 256), (256, n_output)]
    params = []
    for (fan_in, fan_out) in dims:
        key, kw, kb = jax.random.split(key, 3)
        bound = 1.0 / jnp.sqrt(fan_in)
        w = jax.random.uniform(kw, (fan_in, fan_out), jnp.float32, -bound, bound)
        b = jax.random.uniform(kb, (fan_out,), jnp.float32, -bound, bound)
        params.append((w, b))
    return params


def my_mlp_reference(x, params):
    """Plain-JAX f32 reference of the forward pass."""
    (w0, b0), (w1, b1), (w2, b2), (w3, b3) = params
    h = jnp.maximum(x @ w0 + b0, 0.0)
    h = jnp.maximum(h @ w1 + b1, 0.0)
    h = jnp.maximum(h @ w2 + b2, 0.0)
    return h @ w3 + b3


if __name__ == "__main__":
    key = jax.random.PRNGKey(0)
    n_feature, n_hidden, n_output = 32, 64, 4

    key, kp = jax.random.split(key)
    params = init_params(kp, n_feature, n_hidden, n_output)
    prepared = prepare_params(params)    # one-time bf16 cast / bias fusion

    # (a) Tiny batch: single grid step, whole batch resident, no padding.
    key, k1 = jax.random.split(key)
    x_small = jax.random.normal(k1, (16, n_feature), jnp.float32)
    out_small = jax.block_until_ready(my_mlp_forward(x_small, prepared))
    ref_small = my_mlp_reference(x_small, params)
    assert out_small.shape == (16, n_output)
    # bf16 matmul inputs with f32 accumulation -> loosened tolerance.
    assert jnp.allclose(out_small, ref_small, atol=3e-2, rtol=3e-2), (
        float(jnp.max(jnp.abs(out_small - ref_small))))

    # (b) Multi-tile pipelined path (tb forced so it tiles on every generation).
    key, k2 = jax.random.split(key)
    x_mid = jax.random.normal(k2, (384, n_feature), jnp.float32)
    out_mid = jax.block_until_ready(my_mlp_forward(x_mid, prepared, tb=128))
    ref_mid = my_mlp_reference(x_mid, params)
    assert out_mid.shape == (384, n_output)
    assert jnp.allclose(out_mid, ref_mid, atol=3e-2, rtol=3e-2), (
        float(jnp.max(jnp.abs(out_mid - ref_mid))))

    # (c) Ragged batch: exercises the padded fallback + row/lane output slice.
    key, k3 = jax.random.split(key)
    x_rag = jax.random.normal(k3, (200, n_feature), jnp.float32)
    out_rag = jax.block_until_ready(my_mlp_forward(x_rag, prepared, tb=128))
    ref_rag = my_mlp_reference(x_rag, params)
    assert out_rag.shape == (200, n_output)
    assert jnp.allclose(out_rag, ref_rag, atol=3e-2, rtol=3e-2), (
        float(jnp.max(jnp.abs(out_rag - ref_rag))))

    print("KERNEL_OK")
</pallas_src>

<mosaic_0001>
module attributes {stable_mosaic.version = 11 : i64} {
  func.func @_mlp_kernel(%arg0: i32, %arg1: memref<16x32xf32, #tpu.memory_space<vmem>>, %arg2: memref<32x64xbf16, #tpu.memory_space<vmem>>, %arg3: memref<64x512xbf16, #tpu.memory_space<vmem>>, %arg4: memref<512x256xbf16, #tpu.memory_space<vmem>>, %arg5: memref<256x128xbf16, #tpu.memory_space<vmem>>, %arg6: memref<1x1024xf32, #tpu.memory_space<vmem>>, %arg7: memref<16x128xf32, #tpu.memory_space<vmem>>) attributes {dimension_semantics = [#tpu.dimension_semantics<parallel>], iteration_bounds = array<i64: 1>, scalar_prefetch = 0 : i64, scratch_operands = 0 : i64, tpu.core_type = #tpu.core_type<tc>, window_params = [{transform_indices = @transform_0, window_bounds = array<i64: 16, 32>}, {pipeline_mode = #tpu.pipeline_mode<synchronous>, transform_indices = @transform_1, window_bounds = array<i64: 32, 64>}, {pipeline_mode = #tpu.pipeline_mode<synchronous>, transform_indices = @transform_2, window_bounds = array<i64: 64, 512>}, {pipeline_mode = #tpu.pipeline_mode<synchronous>, transform_indices = @transform_3, window_bounds = array<i64: 512, 256>}, {pipeline_mode = #tpu.pipeline_mode<synchronous>, transform_indices = @transform_4, window_bounds = array<i64: 256, 128>}, {pipeline_mode = #tpu.pipeline_mode<synchronous>, transform_indices = @transform_5, window_bounds = array<i64: 1, 1024>}, {transform_indices = @transform_6, window_bounds = array<i64: 16, 128>}]} {
    %c0 = arith.constant 0 : index
    %c0_0 = arith.constant 0 : index
    %0 = vector.load %arg1[%c0, %c0_0] : memref<16x32xf32, #tpu.memory_space<vmem>>, vector<16x32xf32>
    %1 = arith.truncf %0 : vector<16x32xf32> to vector<16x32xbf16>
    %c0_1 = arith.constant 0 : index
    %c0_2 = arith.constant 0 : index
    %2 = vector.load %arg2[%c0_1, %c0_2] : memref<32x64xbf16, #tpu.memory_space<vmem>>, vector<32x64xbf16>
    %cst = arith.constant dense<0.000000e+00> : vector<16x64xf32>
    %3 = tpu.matmul %1, %2, %cst {dimension_numbers = #tpu.dot_dimension_numbers<[1], [0], [0], [1], [0, 0, 1, 1], [], []>} : vector<16x32xbf16>, vector<32x64xbf16>, vector<16x64xf32> -> vector<16x64xf32>
    %c0_3 = arith.constant 0 : index
    %c0_4 = arith.constant 0 : index
    %4 = vector.load %arg6[%c0_3, %c0_4] : memref<1x1024xf32, #tpu.memory_space<vmem>>, vector<1x64xf32>
    %5 = vector.broadcast %4 : vector<1x64xf32> to vector<16x64xf32>
    %6 = arith.addf %3, %5 : vector<16x64xf32>
    %cst_5 = arith.constant 0.000000e+00 : f32
    %7 = vector.broadcast %cst_5 : f32 to vector<16x64xf32>
    %8 = arith.maximumf %6, %7 : vector<16x64xf32>
    %9 = arith.truncf %8 : vector<16x64xf32> to vector<16x64xbf16>
    %c0_6 = arith.constant 0 : index
    %c0_7 = arith.constant 0 : index
    %10 = vector.load %arg3[%c0_6, %c0_7] : memref<64x512xbf16, #tpu.memory_space<vmem>>, vector<64x512xbf16>
    %cst_8 = arith.constant dense<0.000000e+00> : vector<16x512xf32>
    %11 = tpu.matmul %9, %10, %cst_8 {dimension_numbers = #tpu.dot_dimension_numbers<[1], [0], [0], [1], [0, 0, 1, 1], [], []>} : vector<16x64xbf16>, vector<64x512xbf16>, vector<16x512xf32> -> vector<16x512xf32>
    %c0_9 = arith.constant 0 : index
    %c128 = arith.constant 128 : index
    %12 = vector.load %arg6[%c0_9, %c128] : memref<1x1024xf32, #tpu.memory_space<vmem>>, vector<1x512xf32>
    %13 = vector.broadcast %12 : vector<1x512xf32> to vector<16x512xf32>
    %14 = arith.addf %11, %13 : vector<16x512xf32>
    %cst_10 = arith.constant 0.000000e+00 : f32
    %15 = vector.broadcast %cst_10 : f32 to vector<16x512xf32>
    %16 = arith.maximumf %14, %15 : vector<16x512xf32>
    %17 = arith.truncf %16 : vector<16x512xf32> to vector<16x512xbf16>
    %c0_11 = arith.constant 0 : index
    %c0_12 = arith.constant 0 : index
    %18 = vector.load %arg4[%c0_11, %c0_12] : memref<512x256xbf16, #tpu.memory_space<vmem>>, vector<512x256xbf16>
    %cst_13 = arith.constant dense<0.000000e+00> : vector<16x256xf32>
    %19 = tpu.matmul %17, %18, %cst_13 {dimension_numbers = #tpu.dot_dimension_numbers<[1], [0], [0], [1], [0, 0, 1, 1], [], []>} : vector<16x512xbf16>, vector<512x256xbf16>, vector<16x256xf32> -> vector<16x256xf32>
    %c0_14 = arith.constant 0 : index
    %c640 = arith.constant 640 : index
    %20 = vector.load %arg6[%c0_14, %c640] : memref<1x1024xf32, #tpu.memory_space<vmem>>, vector<1x256xf32>
    %21 = vector.broadcast %20 : vector<1x256xf32> to vector<16x256xf32>
    %22 = arith.addf %19, %21 : vector<16x256xf32>
    %cst_15 = arith.constant 0.000000e+00 : f32
    %23 = vector.broadcast %cst_15 : f32 to vector<16x256xf32>
    %24 = arith.maximumf %22, %23 : vector<16x256xf32>
    %25 = arith.truncf %24 : vector<16x256xf32> to vector<16x256xbf16>
    %c0_16 = arith.constant 0 : index
    %c0_17 = arith.constant 0 : index
    %26 = vector.load %arg5[%c0_16, %c0_17] : memref<256x128xbf16, #tpu.memory_space<vmem>>, vector<256x128xbf16>
    %cst_18 = arith.constant dense<0.000000e+00> : vector<16x128xf32>
    %27 = tpu.matmul %25, %26, %cst_18 {dimension_numbers = #tpu.dot_dimension_numbers<[1], [0], [0], [1], [0, 0, 1, 1], [], []>} : vector<16x256xbf16>, vector<256x128xbf16>, vector<16x128xf32> -> vector<16x128xf32>
    %c0_19 = arith.constant 0 : index
    %c896 = arith.constant 896 : index
    %28 = vector.load %arg6[%c0_19, %c896] : memref<1x1024xf32, #tpu.memory_space<vmem>>, vector<1x128xf32>
    %29 = vector.broadcast %28 : vector<1x128xf32> to vector<16x128xf32>
    %30 = arith.addf %27, %29 : vector<16x128xf32>
    %c0_20 = arith.constant 0 : index
    %c0_21 = arith.constant 0 : index
    %31 = vector.load %arg7[%c0_20, %c0_21] : memref<16x128xf32, #tpu.memory_space<vmem>>, vector<16x128xf32>
    tpu.vector_store %arg7[%c0_20, %c0_21], %30 {strides = array<i32>} : memref<16x128xf32, #tpu.memory_space<vmem>>, vector<16x128xf32>,
    return
  }
  func.func @transform_0(%arg0: i32) -> (i32, i32) {
    %c0_i32 = arith.constant 0 : i32
    %c0_i32_0 = arith.constant 0 : i32
    return %arg0, %c0_i32 : i32, i32
  }
  func.func @transform_1(%arg0: i32) -> (i32, i32) {
    %c0_i32 = arith.constant 0 : i32
    %c0_i32_0 = arith.constant 0 : i32
    %c0_i32_1 = arith.constant 0 : i32
    return %c0_i32, %c0_i32_0 : i32, i32
  }
  func.func @transform_2(%arg0: i32) -> (i32, i32) {
    %c0_i32 = arith.constant 0 : i32
    %c0_i32_0 = arith.constant 0 : i32
    %c0_i32_1 = arith.constant 0 : i32
    return %c0_i32, %c0_i32_0 : i32, i32
  }
  func.func @transform_3(%arg0: i32) -> (i32, i32) {
    %c0_i32 = arith.constant 0 : i32
    %c0_i32_0 = arith.constant 0 : i32
    %c0_i32_1 = arith.constant 0 : i32
    return %c0_i32, %c0_i32_0 : i32, i32
  }
  func.func @transform_4(%arg0: i32) -> (i32, i32) {
    %c0_i32 = arith.constant 0 : i32
    %c0_i32_0 = arith.constant 0 : i32
    %c0_i32_1 = arith.constant 0 : i32
    return %c0_i32, %c0_i32_0 : i32, i32
  }
  func.func @transform_5(%arg0: i32) -> (i32, i32) {
    %c0_i32 = arith.constant 0 : i32
    %c0_i32_0 = arith.constant 0 : i32
    %c0_i32_1 = arith.constant 0 : i32
    return %c0_i32, %c0_i32_0 : i32, i32
  }
  func.func @transform_6(%arg0: i32) -> (i32, i32) {
    %c0_i32 = arith.constant 0 : i32
    %c0_i32_0 = arith.constant 0 : i32
    return %arg0, %c0_i32 : i32, i32
  }
}

</mosaic_0001>

<bundles_post_ra>
// kernel: tpu_custom_call.1
= control target key start
LH: loop header
LB: loop body
LE: loop exit
PB: predicated region body
PF: predicated region fallthrough
CT: control target
= control target key end

     0   :  { %11 = vsyncpa [#allocation3], 0  ;;  %s1813_s0 = inlined_call_operand.hbm [shape: f32[16,32], index: 0, kind: input, shape index: {}]   ;;  %s1814_s1 = inlined_call_operand.hbm [shape: bf16[32,64], index: 1, kind: input, shape index: {}]   ;;  %s1815_s2 = inlined_call_operand.hbm [shape: bf16[64,512], index: 2, kind: input, shape index: {}]   ;;  %s1816_s3 = inlined_call_operand.hbm [shape: bf16[512,256], index: 3, kind: input, shape index: {}]   ;;  %s1817_s4 = inlined_call_operand.hbm [shape: bf16[256,128], index: 4, kind: input, shape index: {}]   ;;  %s1818_s5 = inlined_call_operand.hbm [shape: f32[1,1024], index: 5, kind: input, shape index: {}]   ;;  %s1819_s6 = inlined_call_operand.hbm [shape: f32[16,128], index: 6, kind: output, shape index: {}]  }
   0x1   :  { %12 = vsyncpa [#allocation6], 0 }
   0x2   :  { %13 = vsyncpa [#allocation9], 0 }
   0x3   :  { %14 = vsyncpa [#allocation12], 0  ;;  %s33_s23 = sshll.u32 %s1814_s1, 4  ;;  %s34_s23 = int_to_ptr.hbm [resolvable:$true] %s33_s23 }
   0x4   :  { %15 = vsyncpa [#allocation4], 0  ;;  %s1719_s24 = smov [#allocation5]   ;;  %s1720_s26 = smov 64  }
   0x5   :  { %s35_s25 = sshll.u32 %s1719_s24, 4  ;;  %s1721_s27 = smov 4   ;;  %s36_s25 = int_to_ptr.vmem [resolvable:$true] %s35_s25 }
   0x6   :  { %41 = dma.hbm_to_vmem [thread:$0]  %s34_s23, 256, %s36_s25, [#allocation6], %s1720_s26, %s1720_s26, %s1721_s27  }
   0x7   :  { %s59_s30 = sshll.u32 %s1816_s3, 4  ;;  %s1722_s7 = smov [#allocation8]   ;;  %s60_s30 = int_to_ptr.hbm [resolvable:$true] %s59_s30 }
   0x8   :  { %s61_s8 = sshll.u32 %s1722_s7, 4  ;;  %s20_s10 = sshll.u32 %s1813_s0, 4  ;;  %s62_s8 = int_to_ptr.vmem [resolvable:$true] %s61_s8  ;;  %s21_s10 = int_to_ptr.hbm [resolvable:$true] %s20_s10 }
   0x9   :  { %s1723_s11 = smov 128   ;;  %s1724_s12 = smov 8  }
   0xa   :  { %67 = dma.hbm_to_vmem [thread:$0]  %s60_s30, 8192, %s62_s8, [#allocation9], %s1723_s11, %s1723_s11, %s1724_s12  }
   0xb   :  { %s46_s15 = sshll.u32 %s1815_s2, 4  ;;  %s1725_s3 = smov [#allocation2]   ;;  %s47_s15 = int_to_ptr.hbm [resolvable:$true] %s46_s15 }
   0xc   :  { %s22_s16 = sshll.u32 %s1725_s3, 4  ;;  %s1726_s0 = smov [#allocation7]   ;;  %s23_s16 = int_to_ptr.vmem [resolvable:$true] %s22_s16 }
   0xd   :  { %28 = dma.hbm_to_vmem [thread:$0]  %s21_s10, 256, %s23_s16, [#allocation3], %s1723_s11, %s1723_s11, %s1724_s12  }
   0xe   :  { %s48_s17 = sshll.u32 %s1726_s0, 4  ;;  %s1727_s18 = smov 256   ;;  %s49_s17 = int_to_ptr.vmem [resolvable:$true] %s48_s17 }
   0xf   :  { %s1728_s19 = smov 16   ;;  %s72_s22 = sshll.u32 %s1817_s4, 4  ;;  %s73_s22 = int_to_ptr.hbm [resolvable:$true] %s72_s22 }
  0x10   :  { %54 = dma.hbm_to_vmem [thread:$0]  %s47_s15, 2048, %s49_s17, [#allocation6], %s1727_s18, %s1727_s18, %s1728_s19  }
  0x11   :  { %s1729_s2 = smov [#allocation10]   ;;  %s86_s28 = sshll.u32 %s1818_s5, 4  ;;  %s87_s28 = int_to_ptr.hbm [resolvable:$true] %s86_s28 }
  0x12   :  { %s74_s23 = sshll.u32 %s1729_s2, 4  ;;  %s1730_s29 = smov [#allocation11]   ;;  %s75_s23 = int_to_ptr.vmem [resolvable:$true] %s74_s23 }
  0x13   :  { %80 = dma.hbm_to_vmem [thread:$0]  %s73_s22, 2048, %s75_s23, [#allocation9], %s1720_s26, %s1720_s26, %s1721_s27  }
  0x14   :  { %s88_s30 = sshll.u32 %s1730_s29, 4  ;;  %s89_s30 = int_to_ptr.vmem [resolvable:$true] %s88_s30 }
  0x15   :  { %91 = dma.hbm_to_vmem [thread:$0]  %s87_s28, 128, %s89_s30, [#allocation12]  }
  0x16   :  { %1709 = dma.done.wait [#allocation3], 256  }
  0x17   :  { %1710 = vsyncadd [#allocation3], 4294967040 }
  0x18   :  { %1711 = dma.done.wait [#allocation6], 2304  }
  0x19   :  { %1712 = vsyncadd [#allocation6], 4294964992 }
  0x1a   :  { %1713 = dma.done.wait [#allocation9], 10240  }
  0x1b   :  { %1714 = vsyncadd [#allocation9], 4294957056 }
  0x1c   :  { %1715 = dma.done.wait [#allocation12], 128  }
  0x1d   :  { %1716 = vsyncadd [#allocation12], 4294967168  ;;  %v1429_v0 = vld [vmem:[#allocation5 + $0x8] sm:$0xff]  ;;  %v1428_v1 = vld [vmem:[#allocation5] sm:$0xff]  ;;  %vm140_vm0 = vcmask 261120   ;;  %vm267_vm1 = vcmask 523264  }
  0x1e   :  { %150 = vmatpush.bf16.msra.mxu0 %v1429_v0  ;;  %v117_v2 = vld [vmem:[#allocation2] sm:$0xff]  ;;  %v118_v3 = vld [vmem:[#allocation2 + $0x8] sm:$0xff]  ;;  %v1444_v6 = vld [vmem:[#allocation7 + $0x6c] sm:$0xf0]  ;;  %s1731_s4 = smov [#allocation13]   ;;  %s1015_s7 = sshll.u32 %s1819_s6, 4  ;;  %s1016_s7 = int_to_ptr.hbm [resolvable:$true] %s1015_s7 }
  0x1f   :  { %v119_v4 = vpack.c.bf16 %v118_v3, %v117_v2  ;;  %v1090_v5 = vld [vmem:[#allocation7 + $0x60] sm:$0xf]  ;;  %v1442_v7 = vld [vmem:[#allocation7 + $0x64] sm:$0xf]  ;;  %v1092_v9 = vld [vmem:[#allocation7 + $0x70] sm:$0xf0] }
  0x20   :  { %v1091_v8 = vor.u32 %v1444_v6, %v1090_v5  ;;  %v1095_v10 = vor.u32 %v1442_v7, %v1092_v9  ;;  %v1074_v11 = vld [vmem:[#allocation7 + $0x40] sm:$0xf]  ;;  %v1440_v12 = vld [vmem:[#allocation7 + $0x4c] sm:$0xf0]  ;;  %v1438_v13 = vld [vmem:[#allocation7 + $0x44] sm:$0xf] }
  0x21   :  { %v1075_v14 = vor.u32 %v1440_v12, %v1074_v11  ;;  %v1076_v15 = vld [vmem:[#allocation7 + $0x50] sm:$0xf0]  ;;  %v1058_v17 = vld [vmem:[#allocation7 + $0x20] sm:$0xf]  ;;  %v1436_v18 = vld [vmem:[#allocation7 + $0x2c] sm:$0xf0] }
  0x22   :  { %151 = vmatpush.bf16.msra.mxu0 %v1428_v1  ;;  %275 = vmatpush.bf16.msra.mxu3 %v1091_v8  ;;  %v1079_v16 = vor.u32 %v1438_v13, %v1076_v15  ;;  %v1434_v19 = vld [vmem:[#allocation7 + $0x24] sm:$0xf]  ;;  %v1059_v20 = vor.u32 %v1436_v18, %v1058_v17  ;;  %v1060_v21 = vld [vmem:[#allocation7 + $0x30] sm:$0xf0]  ;;  %v1042_v23 = vld [vmem:[#allocation7] sm:$0xf] }
  0x23   :  { %v1063_v22 = vor.u32 %v1434_v19, %v1060_v21  ;;  %v1432_v24 = vld [vmem:[#allocation7 + $0xc] sm:$0xf0]  ;;  %v1430_v25 = vld [vmem:[#allocation7 + $0x4] sm:$0xf]  ;;  %v1044_v27 = vld [vmem:[#allocation7 + $0x10] sm:$0xf0] }
  0x24   :  { %v1043_v26 = vor.u32 %v1432_v24, %v1042_v23  ;;  %v1047_v28 = vor.u32 %v1430_v25, %v1044_v27  ;;  %v1098_v29 = vld [vmem:[#allocation7 + $0x68] sm:$0xf]  ;;  %v1445_v30 = vld [vmem:[#allocation7 + $0x74] sm:$0xf0]  ;;  %v1443_v32 = vld [vmem:[#allocation7 + $0x6c] sm:$0xf] }
  0x25   :  { %1039 = vmatmul.msk.bf16.vlgmr.msra.gmra.mxu0 %vm140_vm0, %v119_v4  ;;  %v1099_v31 = vor.u32 %v1445_v30, %v1098_v29  ;;  %v1100_v33 = vld [vmem:[#allocation7 + $0x78] sm:$0xf0]  ;;  %v1082_v35 = vld [vmem:[#allocation7 + $0x48] sm:$0xf]  ;;  %v1441_v36 = vld [vmem:[#allocation7 + $0x54] sm:$0xf0] }
  0x26   :  { %289 = vmatpush.bf16.msrb.mxu0 %v1095_v10  ;;  %276 = vmatpush.bf16.msra.mxu3 %v1075_v14  ;;  %v1103_v34 = vor.u32 %v1443_v32, %v1100_v33  ;;  %v1439_v37 = vld [vmem:[#allocation7 + $0x4c] sm:$0xf]  ;;  %v1083_v38 = vor.u32 %v1441_v36, %v1082_v35  ;;  %v1084_v39 = vld [vmem:[#allocation7 + $0x58] sm:$0xf0]  ;;  %v1066_v41 = vld [vmem:[#allocation7 + $0x28] sm:$0xf] }
  0x27   :  { %v1087_v40 = vor.u32 %v1439_v37, %v1084_v39  ;;  %v1437_v42 = vld [vmem:[#allocation7 + $0x34] sm:$0xf0]  ;;  %v1435_v43 = vld [vmem:[#allocation7 + $0x2c] sm:$0xf]  ;;  %v1068_v44 = vld [vmem:[#allocation7 + $0x38] sm:$0xf0] }
  0x28   :  { %v1067_v45 = vor.u32 %v1437_v42, %v1066_v41  ;;  %v1071_v46 = vor.u32 %v1435_v43, %v1068_v44  ;;  %v1050_v47 = vld [vmem:[#allocation7 + $0x8] sm:$0xf]  ;;  %v1433_v48 = vld [vmem:[#allocation7 + $0x14] sm:$0xf0]  ;;  %v1431_v49 = vld [vmem:[#allocation7 + $0xc] sm:$0xf] }
  0x29   :  { %v1052_v50 = vld [vmem:[#allocation7 + $0x18] sm:$0xf0]  ;;  %v1051_v51 = vor.u32 %v1433_v48, %v1050_v47  ;;  %v1230_v53 = vld [vmem:[#allocation8 + $0xf0] sm:$0xf]  ;;  %v1477_v54 = vld [vmem:[#allocation8 + $0xf4] sm:$0xf0] }
  0x2a   :  { %290 = vmatpush.bf16.msrb.mxu0 %v1079_v16  ;;  %277 = vmatpush.bf16.msra.mxu3 %v1059_v20  ;;  %v1055_v52 = vor.u32 %v1431_v49, %v1052_v50  ;;  %v1222_v55 = vld [vmem:[#allocation8 + $0xe0] sm:$0xf]  ;;  %v1231_v57 = vor.u32 %v1477_v54, %v1230_v53  ;;  %v1475_v58 = vld [vmem:[#allocation8 + $0xe4] sm:$0xf0]  ;;  %v1166_v59 = vld [vmem:[#allocation8 + $0x70] sm:$0xf] }
  0x2b   :  { %v1461_v60 = vld [vmem:[#allocation8 + $0x74] sm:$0xf0]  ;;  %v1158_v62 = vld [vmem:[#allocation8 + $0x60] sm:$0xf]  ;;  %v1223_v63 = vor.u32 %v1475_v58, %v1222_v55  ;;  %v1459_v0 = vld [vmem:[#allocation8 + $0x64] sm:$0xf0] }
  0x2c   :  { %v1167_v61 = vor.u32 %v1461_v60, %v1166_v59  ;;  %743 = vmatpush.bf16.msra.mxu2 %v1231_v57  ;;  %v1539_v1 = vld [vmem:[#allocation11] ss:$0 sm:$0xff]  ;;  %v1214_v2 = vld [vmem:[#allocation8 + $0xd0] sm:$0xf]  ;;  %v1473_v3 = vld [vmem:[#allocation8 + $0xd4] sm:$0xf0]  ;;  %v1159_v4 = vor.u32 %v1459_v0, %v1158_v62 }
  0x2d   :  { %v1150_v5 = vld [vmem:[#allocation8 + $0x50] sm:$0xf]  ;;  %v1457_v6 = vld [vmem:[#allocation8 + $0x54] sm:$0xf0]  ;;  %v1215_v7 = vor.u32 %v1473_v3, %v1214_v2  ;;  %v1206_v9 = vld [vmem:[#allocation8 + $0xc0] sm:$0xf] }
  0x2e   :  { %291 = vmatpush.bf16.msrb.mxu0 %v1063_v22  ;;  %278 = vmatpush.bf16.msra.mxu3 %v1043_v26  ;;  %v1471_v10 = vld [vmem:[#allocation8 + $0xc4] sm:$0xf0]  ;;  %v1151_v11 = vor.u32 %v1457_v6, %v1150_v5  ;;  %v1358_v13 = vld [vmem:[#allocation8 + $0x1f0] sm:$0xf]  ;;  %v1509_v15 = vld [vmem:[#allocation8 + $0x1f4] sm:$0xf0] }
  0x2f   :  { %729 = vmatpush.bf16.msra.mxu1 %v1167_v61  ;;  %v1142_v16 = vld [vmem:[#allocation8 + $0x40] sm:$0xf]  ;;  %v1455_v17 = vld [vmem:[#allocation8 + $0x44] sm:$0xf0]  ;;  %v1207_v18 = vor.u32 %v1471_v10, %v1206_v9  ;;  %v1294_v19 = vld [vmem:[#allocation8 + $0x170] sm:$0xf]  ;;  %v1359_v25 = vor.u32 %v1509_v15, %v1358_v13 }
  0x30   :  { %744 = vmatpush.bf16.msra.mxu2 %v1223_v63  ;;  %v1493_v20 = vld [vmem:[#allocation8 + $0x174] sm:$0xf0]  ;;  %v1198_v23 = vld [vmem:[#allocation8 + $0xb0] sm:$0xf]  ;;  %v1143_v26 = vor.u32 %v1455_v17, %v1142_v16  ;;  %v1350_v27 = vld [vmem:[#allocation8 + $0x1e0] sm:$0xf] }
  0x31   :  { %v1469_v24 = vld [vmem:[#allocation8 + $0xb4] sm:$0xf0]  ;;  %v1507_v29 = vld [vmem:[#allocation8 + $0x1e4] sm:$0xf0]  ;;  %v1134_v30 = vld [vmem:[#allocation8 + $0x30] sm:$0xf]  ;;  %v1295_v32 = vor.u32 %v1493_v20, %v1294_v19 }
  0x32   :  { %292 = vmatpush.bf16.msrb.mxu0 %v1047_v28  ;;  %303 = vmatpush.bf16.msrb.mxu3 %v1099_v31  ;;  %v1453_v31 = vld [vmem:[#allocation8 + $0x34] sm:$0xf0]  ;;  %v1199_v33 = vor.u32 %v1469_v24, %v1198_v23  ;;  %v1491_v35 = vld [vmem:[#allocation8 + $0x164] sm:$0xf0]  ;;  %v1190_v36 = vld [vmem:[#allocation8 + $0xa0] sm:$0xf] }
  0x33   :  { %730 = vmatpush.bf16.msra.mxu1 %v1159_v4  ;;  %v1467_v37 = vld [vmem:[#allocation8 + $0xa4] sm:$0xf0]  ;;  %v1135_v39 = vor.u32 %v1453_v31, %v1134_v30  ;;  %v1505_v41 = vld [vmem:[#allocation8 + $0x1d4] sm:$0xf0]  ;;  %v1126_v42 = vld [vmem:[#allocation8 + $0x20] sm:$0xf] }
  0x34   :  { %745 = vmatpush.bf16.msra.mxu2 %v1215_v7  ;;  %v1451_v43 = vld [vmem:[#allocation8 + $0x24] sm:$0xf0]  ;;  %v1465_v47 = vld [vmem:[#allocation8 + $0x94] sm:$0xf0]  ;;  %v1334_v50 = vld [vmem:[#allocation8 + $0x1c0] sm:$0xf] }
  0x35   :  { %v1127_v49 = vor.u32 %v1451_v43, %v1126_v42  ;;  %v1174_v53 = vld [vmem:[#allocation8 + $0x80] sm:$0xf]  ;;  %v1463_v54 = vld [vmem:[#allocation8 + $0x84] sm:$0xf0]  ;;  %v1476_v57 = vld [vmem:[#allocation8 + $0xf4] sm:$0xf] }
  0x36   :  { %317 = vmatpush.bf16.msra.mxu0 %v1103_v34  ;;  %304 = vmatpush.bf16.msrb.mxu3 %v1083_v38  ;;  %v1286_v34 = vld [vmem:[#allocation8 + $0x160] sm:$0xf]  ;;  %v1351_v38 = vor.u32 %v1507_v29, %v1350_v27  ;;  %v1232_v58 = vld [vmem:[#allocation8 + $0xf8] sm:$0xf0]  ;;  %v1118_v60 = vld [vmem:[#allocation8 + $0x10] sm:$0xf] }
  0x37   :  { %731 = vmatpush.bf16.msra.mxu1 %v1151_v11  ;;  %v1287_v44 = vor.u32 %v1491_v35, %v1286_v34  ;;  %v1235_v59 = vor.u32 %v1476_v57, %v1232_v58  ;;  %v1449_v61 = vld [vmem:[#allocation8 + $0x14] sm:$0xf0]  ;;  %v1278_v62 = vld [vmem:[#allocation8 + $0x150] sm:$0xf]  ;;  %v1474_v5 = vld [vmem:[#allocation8 + $0xe4] sm:$0xf] }
  0x38   :  { %746 = vmatpush.bf16.msra.mxu2 %v1207_v18  ;;  %v1119_v63 = vor.u32 %v1449_v61, %v1118_v60  ;;  %v1489_v0 = vld [vmem:[#allocation8 + $0x154] sm:$0xf0]  ;;  %v1326_v2 = vld [vmem:[#allocation8 + $0x1b0] sm:$0xf]  ;;  %v1224_v6 = vld [vmem:[#allocation8 + $0xe8] sm:$0xf0] }
  0x39   :  { %v1501_v3 = vld [vmem:[#allocation8 + $0x1b4] sm:$0xf0]  ;;  %v1227_v7 = vor.u32 %v1474_v5, %v1224_v6  ;;  %v1447_v9 = vld [vmem:[#allocation8 + $0x4] sm:$0xf0]  ;;  %v1270_v10 = vld [vmem:[#allocation8 + $0x140] sm:$0xf] }
  0x3a   :  { %318 = vmatpush.bf16.msra.mxu0 %v1087_v40  ;;  %305 = vmatpush.bf16.msrb.mxu3 %v1067_v45  ;;  %v1342_v40 = vld [vmem:[#allocation8 + $0x1d0] sm:$0xf]  ;;  %v1191_v45 = vor.u32 %v1467_v37, %v1190_v36  ;;  %v1327_v4 = vor.u32 %v1501_v3, %v1326_v2  ;;  %v1460_v13 = vld [vmem:[#allocation8 + $0x74] sm:$0xf]  ;;  %v1168_v15 = vld [vmem:[#allocation8 + $0x78] sm:$0xf0] }
  0x3b   :  { %732 = vmatpush.bf16.msra.mxu1 %v1143_v26  ;;  %v1343_v48 = vor.u32 %v1505_v41, %v1342_v40  ;;  %v1318_v16 = vld [vmem:[#allocation8 + $0x1a0] sm:$0xf]  ;;  %v1499_v17 = vld [vmem:[#allocation8 + $0x1a4] sm:$0xf0]  ;;  %v1171_v18 = vor.u32 %v1460_v13, %v1168_v15  ;;  %v1472_v20 = vld [vmem:[#allocation8 + $0xd4] sm:$0xf] }
  0x3c   :  { %747 = vmatpush.bf16.msra.mxu2 %v1199_v33  ;;  %v1319_v19 = vor.u32 %v1499_v17, %v1318_v16  ;;  %v1262_v23 = vld [vmem:[#allocation8 + $0x130] sm:$0xf]  ;;  %v1485_v24 = vld [vmem:[#allocation8 + $0x134] sm:$0xf0]  ;;  %v1458_v26 = vld [vmem:[#allocation8 + $0x64] sm:$0xf] }
  0x3d   :  { %v1160_v27 = vld [vmem:[#allocation8 + $0x68] sm:$0xf0]  ;;  %v1310_v29 = vld [vmem:[#allocation8 + $0x190] sm:$0xf]  ;;  %v1497_v30 = vld [vmem:[#allocation8 + $0x194] sm:$0xf0] }
  0x3e   :  { %319 = vmatpush.bf16.msra.mxu0 %v1071_v46  ;;  %306 = vmatpush.bf16.msrb.mxu3 %v1051_v51  ;;  %v1182_v46 = vld [vmem:[#allocation8 + $0x90] sm:$0xf]  ;;  %v1503_v51 = vld [vmem:[#allocation8 + $0x1c4] sm:$0xf0]  ;;  %v1311_v31 = vor.u32 %v1497_v30, %v1310_v29  ;;  %v1208_v33 = vld [vmem:[#allocation8 + $0xc8] sm:$0xf0] }
  0x3f   :  { %733 = vmatpush.bf16.msra.mxu1 %v1135_v39  ;;  %v1335_v55 = vor.u32 %v1503_v51, %v1334_v50  ;;  %v1254_v35 = vld [vmem:[#allocation8 + $0x120] sm:$0xf]  ;;  %v1483_v36 = vld [vmem:[#allocation8 + $0x124] sm:$0xf0]  ;;  %v1152_v39 = vld [vmem:[#allocation8 + $0x58] sm:$0xf0] }
  0x40   :  { %748 = vmatpush.bf16.msra.mxu2 %v1191_v45  ;;  %v1255_v37 = vor.u32 %v1483_v36, %v1254_v35  ;;  %v1302_v41 = vld [vmem:[#allocation8 + $0x180] sm:$0xf]  ;;  %v1495_v42 = vld [vmem:[#allocation8 + $0x184] sm:$0xf0]  ;;  %v1200_v45 = vld [vmem:[#allocation8 + $0xb8] sm:$0xf0] }
  0x41   :  { %v1303_v43 = vor.u32 %v1495_v42, %v1302_v41  ;;  %v1481_v50 = vld [vmem:[#allocation8 + $0x114] sm:$0xf0]  ;;  %v1192_v57 = vld [vmem:[#allocation8 + $0xa8] sm:$0xf0]  ;;  %v1506_v58 = vld [vmem:[#allocation8 + $0x1e4] sm:$0xf] }
  0x42   :  { %320 = vmatpush.bf16.msra.mxu0 %v1055_v52  ;;  %v1183_v52 = vor.u32 %v1465_v47, %v1182_v46  ;;  %v1508_v46 = vld [vmem:[#allocation8 + $0x1f4] sm:$0xf]  ;;  %v1352_v60 = vld [vmem:[#allocation8 + $0x1e8] sm:$0xf0]  ;;  %v1238_v61 = vld [vmem:[#allocation8 + $0x100] sm:$0xf] }
  0x43   :  { %734 = vmatpush.bf16.msra.mxu1 %v1127_v49  ;;  %v1246_v49 = vld [vmem:[#allocation8 + $0x110] sm:$0xf]  ;;  %v1136_v2 = vld [vmem:[#allocation8 + $0x38] sm:$0xf0]  ;;  %v1492_v3 = vld [vmem:[#allocation8 + $0x174] sm:$0xf] }
  0x44   :  { %749 = vmatpush.bf16.msra.mxu2 %v1183_v52  ;;  %v1247_v52 = vor.u32 %v1481_v50, %v1246_v49  ;;  %v1296_v5 = vld [vmem:[#allocation8 + $0x178] sm:$0xf0]  ;;  %v1450_v13 = vld [vmem:[#allocation8 + $0x24] sm:$0xf]  ;;  %v1288_v17 = vld [vmem:[#allocation8 + $0x168] sm:$0xf0] }
  0x45   :  { %v1299_v6 = vor.u32 %v1492_v3, %v1296_v5  ;;  %v1490_v15 = vld [vmem:[#allocation8 + $0x164] sm:$0xf]  ;;  %v1280_v29 = vld [vmem:[#allocation8 + $0x158] sm:$0xf0]  ;;  %v1112_v35 = vld [vmem:[#allocation8 + $0x8] sm:$0xf0] }
  0x46   :  { %v1486_v36 = vld [vmem:[#allocation8 + $0x144] sm:$0xf]  ;;  %v1496_v49 = vld [vmem:[#allocation8 + $0x194] sm:$0xf]  ;;  %v1312_v50 = vld [vmem:[#allocation8 + $0x198] sm:$0xf0] }
  0x47   :  { %735 = vmatpush.bf16.msra.mxu1 %v1119_v63  ;;  %v1355_v63 = vor.u32 %v1506_v58, %v1352_v60  ;;  %v1498_v42 = vld [vmem:[#allocation8 + $0x1a4] sm:$0xf]  ;;  %v1480_v60 = vld [vmem:[#allocation8 + $0x114] sm:$0xf]  ;;  %s1013_s5 = sshll.u32 %s1731_s4, 4  ;;  %s1014_s5 = int_to_ptr.vmem [resolvable:$true] %s1013_s5 }
  0xa2   :  { %v153_v56 = vpop.f32.mrf.mxu0 }
  0xa3   :  { %v154_v8 = vadd.f32 %v1539_v1, %v153_v56  ;;  %v1175_v56 = vor.u32 %v1463_v54, %v1174_v53  ;;  %v1454_v53 = vld [vmem:[#allocation8 + $0x44] sm:$0xf]  ;;  %v1144_v54 = vld [vmem:[#allocation8 + $0x48] sm:$0xf0] }
  0xa5   :  { %v158_v21 = vmax.f32 %v154_v8, 0.0  ;;  %750 = vmatpush.bf16.msra.mxu2 %v1175_v56  ;;  %v1110_v8 = vld [vmem:[#allocation8] sm:$0xf]  ;;  %v1466_v56 = vld [vmem:[#allocation8 + $0xa4] sm:$0xf] }
  0xa6   :  { %v1111_v11 = vor.u32 %v1447_v9, %v1110_v8  ;;  %v1184_v8 = vld [vmem:[#allocation8 + $0x98] sm:$0xf0] }
  0xa8   :  { %736 = vmatpush.bf16.msra.mxu1 %v1111_v11  ;;  %v1344_v11 = vld [vmem:[#allocation8 + $0x1d8] sm:$0xf0] }
  0xa9   :  { %799 = vmatpush.bf16.msrb.mxu2 %v1235_v59  ;;  %v1195_v59 = vor.u32 %v1466_v56, %v1192_v57  ;;  %v1304_v56 = vld [vmem:[#allocation8 + $0x188] sm:$0xf0] }
  0xaa   :  { %v155_v12 = vpop.f32.mrf.mxu0 }
  0xab   :  { %v156_v14 = vadd.f32 %v1539_v1, %v155_v12  ;;  %v1279_v1 = vor.u32 %v1489_v0, %v1278_v62  ;;  %v1487_v12 = vld [vmem:[#allocation8 + $0x144] sm:$0xf0] }
  0xac   :  { %785 = vmatpush.bf16.msrb.mxu1 %v1171_v18  ;;  %v1479_v62 = vld [vmem:[#allocation8 + $0x104] sm:$0xf0]  ;;  %v1291_v18 = vor.u32 %v1490_v15, %v1288_v17 }
  0xad   :  { %v159_v22 = vmax.f32 %v156_v14, 0.0  ;;  %800 = vmatpush.bf16.msrb.mxu2 %v1227_v7  ;;  %v1271_v14 = vor.u32 %v1487_v12, %v1270_v10  ;;  %v1239_v0 = vor.u32 %v1479_v62, %v1238_v61  ;;  %v1464_v7 = vld [vmem:[#allocation8 + $0x94] sm:$0xf]  ;;  %v1248_v61 = vld [vmem:[#allocation8 + $0x118] sm:$0xf0] }
  0xae   :  { %v1187_v9 = vor.u32 %v1464_v7, %v1184_v8  ;;  %v1504_v10 = vld [vmem:[#allocation8 + $0x1d4] sm:$0xf]  ;;  %v1251_v3 = vor.u32 %v1480_v60, %v1248_v61  ;;  %v1478_v8 = vld [vmem:[#allocation8 + $0x104] sm:$0xf] }
  0xaf   :  { %v160_v28 = vpack.c.bf16 %v159_v22, %v158_v21  ;;  %v1216_v21 = vld [vmem:[#allocation8 + $0xd8] sm:$0xf0]  ;;  %v1347_v12 = vor.u32 %v1504_v10, %v1344_v11 }
  0xb0   :  { %v1219_v22 = vor.u32 %v1472_v20, %v1216_v21  ;;  %v1176_v20 = vld [vmem:[#allocation8 + $0x88] sm:$0xf0]  ;;  %v1502_v21 = vld [vmem:[#allocation8 + $0x1c4] sm:$0xf] }
  0xb1   :  { %1104 = vmatmul.msk.bf16.vlgmr.msra.gmra.mxu3 %vm267_vm1, %v160_v28  ;;  %1105 = vmatmul.msk.bf16.vlgmr.msrb.gmra.mxu0 %vm267_vm1, %v160_v28 }
  0xb2   :  { %771 = vmatpush.bf16.msrb.mxu0 %v1359_v25  ;;  %757 = vmatpush.bf16.msra.mxu3 %v1295_v32  ;;  %v1263_v25 = vor.u32 %v1485_v24, %v1262_v23  ;;  %v1470_v32 = vld [vmem:[#allocation8 + $0xc4] sm:$0xf]  ;;  %v1336_v23 = vld [vmem:[#allocation8 + $0x1c8] sm:$0xf0] }
  0xb3   :  { %801 = vmatpush.bf16.msrb.mxu2 %v1219_v22  ;;  %v1211_v34 = vor.u32 %v1470_v32, %v1208_v33  ;;  %v1339_v24 = vor.u32 %v1502_v21, %v1336_v23  ;;  %v1328_v32 = vld [vmem:[#allocation8 + $0x1b8] sm:$0xf0] }
  0xb6   :  { %772 = vmatpush.bf16.msrb.mxu0 %v1351_v38  ;;  %758 = vmatpush.bf16.msra.mxu3 %v1287_v44  ;;  %v1456_v38 = vld [vmem:[#allocation8 + $0x54] sm:$0xf] }
  0xb7   :  { %802 = vmatpush.bf16.msrb.mxu2 %v1211_v34  ;;  %v1155_v40 = vor.u32 %v1456_v38, %v1152_v39  ;;  %v1468_v44 = vld [vmem:[#allocation8 + $0xb4] sm:$0xf]  ;;  %v1446_v34 = vld [vmem:[#allocation8 + $0x4] sm:$0xf] }
  0xb8   :  { %v1203_v47 = vor.u32 %v1468_v44, %v1200_v45  ;;  %v1115_v39 = vor.u32 %v1446_v34, %v1112_v35  ;;  %v1513_v34 = vld [vmem:[#allocation10 + $0x18] sm:$0xff] }
  0xb9   :  { %v1525_v35 = vld [vmem:[#allocation10 + $0x78] sm:$0xff] }
  0xba   :  { %773 = vmatpush.bf16.msrb.mxu0 %v1343_v48  ;;  %759 = vmatpush.bf16.msra.mxu3 %v1279_v1  ;;  %v1360_v48 = vld [vmem:[#allocation8 + $0x1f8] sm:$0xf0]  ;;  %v1452_v1 = vld [vmem:[#allocation8 + $0x34] sm:$0xf] }
  0xbb   :  { %v1363_v51 = vor.u32 %v1508_v46, %v1360_v48  ;;  %803 = vmatpush.bf16.msrb.mxu2 %v1203_v47  ;;  %v1484_v46 = vld [vmem:[#allocation8 + $0x134] sm:$0xf]  ;;  %v1264_v47 = vld [vmem:[#allocation8 + $0x138] sm:$0xf0] }
  0xbc   :  { %v1267_v48 = vor.u32 %v1484_v46, %v1264_v47  ;;  %v1519_v47 = vld [vmem:[#allocation10 + $0x48] sm:$0xff] }
  0xbe   :  { %774 = vmatpush.bf16.msrb.mxu0 %v1335_v55  ;;  %760 = vmatpush.bf16.msra.mxu3 %v1271_v14  ;;  %v1147_v55 = vor.u32 %v1454_v53, %v1144_v54  ;;  %v1128_v14 = vld [vmem:[#allocation8 + $0x28] sm:$0xf0]  ;;  %v1315_v53 = vor.u32 %v1496_v49, %v1312_v50 }
  0xbf   :  { %804 = vmatpush.bf16.msrb.mxu2 %v1195_v59  ;;  %v1131_v16 = vor.u32 %v1450_v13, %v1128_v14  ;;  %v1256_v54 = vld [vmem:[#allocation8 + $0x128] sm:$0xf0] }
  0xc1   :  { %1106 = vmatmul.msk.bf16.vlgmr.msrb.gmra.mxu3 %vm267_vm1, %v160_v28  ;;  %1107 = vmatmul.msk.bf16.vlgmr.msra.gmra.mxu0 %vm267_vm1, %v160_v28  ;;  %v1163_v28 = vor.u32 %v1458_v26, %v1160_v27  ;;  %v1120_v26 = vld [vmem:[#allocation8 + $0x18] sm:$0xf0]  ;;  %v1488_v27 = vld [vmem:[#allocation8 + $0x154] sm:$0xf] }
  0xc2   :  { %775 = vmatpush.bf16.msrb.mxu0 %v1327_v4  ;;  %761 = vmatpush.bf16.msra.mxu3 %v1263_v25  ;;  %v1139_v4 = vor.u32 %v1452_v1, %v1136_v2  ;;  %v1448_v25 = vld [vmem:[#allocation8 + $0x14] sm:$0xf]  ;;  %v1283_v30 = vor.u32 %v1488_v27, %v1280_v29 }
  0xc3   :  { %786 = vmatpush.bf16.msrb.mxu1 %v1163_v28  ;;  %805 = vmatpush.bf16.msrb.mxu2 %v1187_v9  ;;  %v1123_v28 = vor.u32 %v1448_v25, %v1120_v26  ;;  %v1240_v9 = vld [vmem:[#allocation8 + $0x108] sm:$0xf0] }
  0xc4   :  { %v1243_v11 = vor.u32 %v1478_v8, %v1240_v9 }
  0xc6   :  { %776 = vmatpush.bf16.msrb.mxu0 %v1319_v19  ;;  %762 = vmatpush.bf16.msra.mxu3 %v1255_v37  ;;  %v1462_v19 = vld [vmem:[#allocation8 + $0x84] sm:$0xf] }
  0xc7   :  { %787 = vmatpush.bf16.msrb.mxu1 %v1155_v40  ;;  %v1179_v22 = vor.u32 %v1462_v19, %v1176_v20  ;;  %v1801_v37 = vld [vmem:[#allocation11 + $0x1] sm:$0xf]  ;;  %v1272_v40 = vld [vmem:[#allocation8 + $0x148] sm:$0xf0] }
  0xc8   :  { %v1275_v41 = vor.u32 %v1486_v36, %v1272_v40  ;;  %v180_v45 = vperm.slane %v1801_v37, 1  ;;  %v179_v62 = vperm.slane %v1801_v37, 0  ;;  %v182_v14 = vperm.slane %v1801_v37, 3  ;;  %v1512_v36 = vld [vmem:[#allocation10 + $0x10] sm:$0xff]  ;;  %v1510_v40 = vld [vmem:[#allocation10] sm:$0xff] }
  0xc9   :  { %806 = vmatpush.bf16.msrb.mxu2 %v1179_v22  ;;  %v181_v19 = vperm.slane %v1801_v37, 2  ;;  %v1524_v37 = vld [vmem:[#allocation10 + $0x70] sm:$0xff] }
  0xca   :  { %777 = vmatpush.bf16.msrb.mxu0 %v1311_v31  ;;  %763 = vmatpush.bf16.msra.mxu3 %v1247_v52  ;;  %v1500_v31 = vld [vmem:[#allocation8 + $0x1b4] sm:$0xf] }
  0xcb   :  { %788 = vmatpush.bf16.msrb.mxu1 %v1147_v55  ;;  %v1331_v33 = vor.u32 %v1500_v31, %v1328_v32  ;;  %v1494_v55 = vld [vmem:[#allocation8 + $0x184] sm:$0xf]  ;;  %v1516_v31 = vld [vmem:[#allocation10 + $0x30] sm:$0xff]  ;;  %v1515_v32 = vld [vmem:[#allocation10 + $0x28] sm:$0xff] }
  0xce   :  { %778 = vmatpush.bf16.msrb.mxu0 %v1303_v43  ;;  %764 = vmatpush.bf16.msra.mxu3 %v1239_v0  ;;  %v1320_v43 = vld [vmem:[#allocation8 + $0x1a8] sm:$0xf0]  ;;  %v1307_v0 = vor.u32 %v1494_v55, %v1304_v56 }
  0xcf   :  { %789 = vmatpush.bf16.msrb.mxu1 %v1139_v4  ;;  %v1323_v44 = vor.u32 %v1498_v42, %v1320_v43  ;;  %v1521_v42 = vld [vmem:[#allocation10 + $0x58] sm:$0xff] }
  0xd2   :  { %827 = vmatpush.bf16.msra.mxu0 %v1363_v51  ;;  %813 = vmatpush.bf16.msrb.mxu3 %v1299_v6  ;;  %v1482_v51 = vld [vmem:[#allocation8 + $0x124] sm:$0xf] }
  0xd3   :  { %790 = vmatpush.bf16.msrb.mxu1 %v1131_v16  ;;  %v1259_v58 = vor.u32 %v1482_v51, %v1256_v54  ;;  %v1518_v51 = vld [vmem:[#allocation10 + $0x40] sm:$0xff] }
  0xd6   :  { %828 = vmatpush.bf16.msra.mxu0 %v1355_v63  ;;  %814 = vmatpush.bf16.msrb.mxu3 %v1291_v18 }
  0xd7   :  { %791 = vmatpush.bf16.msrb.mxu1 %v1123_v28 }
  0xda   :  { %829 = vmatpush.bf16.msra.mxu0 %v1347_v12  ;;  %815 = vmatpush.bf16.msrb.mxu3 %v1283_v30  ;;  %v1517_v30 = vld [vmem:[#allocation10 + $0x38] sm:$0xff] }
  0xdb   :  { %792 = vmatpush.bf16.msrb.mxu1 %v1115_v39  ;;  %v1523_v39 = vld [vmem:[#allocation10 + $0x68] sm:$0xff] }
  0xde   :  { %830 = vmatpush.bf16.msra.mxu0 %v1339_v24  ;;  %816 = vmatpush.bf16.msrb.mxu3 %v1275_v41  ;;  %v1522_v41 = vld [vmem:[#allocation10 + $0x60] sm:$0xff] }
  0xe2   :  { %831 = vmatpush.bf16.msra.mxu0 %v1331_v33  ;;  %817 = vmatpush.bf16.msrb.mxu3 %v1267_v48  ;;  %v1514_v33 = vld [vmem:[#allocation10 + $0x20] sm:$0xff] }
  0xe6   :  { %832 = vmatpush.bf16.msra.mxu0 %v1323_v44  ;;  %818 = vmatpush.bf16.msrb.mxu3 %v1259_v58  ;;  %v1520_v44 = vld [vmem:[#allocation10 + $0x50] sm:$0xff] }
  0xea   :  { %833 = vmatpush.bf16.msra.mxu0 %v1315_v53  ;;  %819 = vmatpush.bf16.msrb.mxu3 %v1251_v3 }
  0xee   :  { %834 = vmatpush.bf16.msra.mxu0 %v1307_v0  ;;  %820 = vmatpush.bf16.msrb.mxu3 %v1243_v11 }
 0x12e   :  { %v294_v38 = vpop.f32.mrf.mxu0 }
 0x12f   :  { %v295_v57 = vadd.f32 %v294_v38, %v180_v45  ;;  %v1511_v38 = vld [vmem:[#allocation10 + $0x8] sm:$0xff] }
 0x131   :  { %v328_v1 = vmax.f32 %v295_v57, 0.0 }
 0x134   :  { %v280_v52 = vpop.f32.mrf.mxu3 }
 0x135   :  { %v281_v4 = vadd.f32 %v280_v52, %v179_v62 }
 0x136   :  { %v296_v59 = vpop.f32.mrf.mxu0 }
 0x137   :  { %v297_v63 = vadd.f32 %v296_v59, %v180_v45  ;;  %v327_v12 = vmax.f32 %v281_v4, 0.0  ;;  %v403_v45 = vld [vmem:[#allocation11 + $0x5] sm:$0x3] }
 0x138   :  { %v405_v48 = vperm.slane %v403_v45, 0  ;;  %v406_v0 = vperm.slane %v403_v45, 1 }
 0x139   :  { %v332_v2 = vmax.f32 %v297_v63, 0.0 }
 0x13b   :  { %v336_v5 = vpack.c.bf16 %v332_v2, %v328_v1 }
 0x13c   :  { %v282_v6 = vpop.f32.mrf.mxu3 }
 0x13d   :  { %v283_v7 = vadd.f32 %v282_v6, %v179_v62  ;;  %751 = vmatmul.bf16.vlgmr.msra.gmra.mxu2 %v336_v5 }
 0x13e   :  { %v322_v10 = vpop.f32.mrf.mxu0  ;;  %993 = vmatpush.bf16.msra.mxu2 %v1525_v35 }
 0x13f   :  { %v331_v13 = vmax.f32 %v283_v7, 0.0  ;;  %v323_v17 = vadd.f32 %v322_v10, %v182_v14 }
 0x141   :  { %v335_v15 = vpack.c.bf16 %v331_v13, %v327_v12  ;;  %v330_v21 = vmax.f32 %v323_v17, 0.0 }
 0x142   :  { %994 = vmatpush.bf16.msra.mxu2 %v1524_v37 }
 0x143   :  { %737 = vmatmul.bf16.vlgmr.msra.gmra.mxu1 %v335_v15 }
 0x144   :  { %v308_v16 = vpop.f32.mrf.mxu3  ;;  %979 = vmatpush.bf16.msra.mxu1 %v1517_v30 }
 0x145   :  { %v309_v23 = vadd.f32 %v308_v16, %v181_v19 }
 0x146   :  { %v324_v18 = vpop.f32.mrf.mxu0  ;;  %995 = vmatpush.bf16.msra.mxu2 %v1523_v39 }
 0x147   :  { %v325_v20 = vadd.f32 %v324_v18, %v182_v14  ;;  %v329_v27 = vmax.f32 %v309_v23, 0.0 }
 0x148   :  { %980 = vmatpush.bf16.msra.mxu1 %v1516_v31 }
 0x149   :  { %v334_v22 = vmax.f32 %v325_v20, 0.0 }
 0x14a   :  { %996 = vmatpush.bf16.msra.mxu2 %v1522_v41 }
 0x14b   :  { %v338_v24 = vpack.c.bf16 %v334_v22, %v330_v21 }
 0x14c   :  { %v310_v25 = vpop.f32.mrf.mxu3  ;;  %981 = vmatpush.bf16.msra.mxu1 %v1515_v32 }
 0x14d   :  { %v311_v26 = vadd.f32 %v310_v25, %v181_v19  ;;  %779 = vmatmul.bf16.vlgmr.msrb.gmra.mxu0 %v338_v24  ;;  %807 = vmatmul.bf16.vlgmr.msrb.gmra.mxu2 %v336_v5 }
 0x14e   :  { %997 = vmatpush.bf16.msra.mxu2 %v1521_v42 }
 0x14f   :  { %v333_v28 = vmax.f32 %v311_v26, 0.0 }
 0x150   :  { %982 = vmatpush.bf16.msra.mxu1 %v1514_v33 }
 0x151   :  { %v337_v29 = vpack.c.bf16 %v333_v28, %v329_v27 }
 0x152   :  { %998 = vmatpush.bf16.msra.mxu2 %v1520_v44 }
 0x153   :  { %765 = vmatmul.bf16.vlgmr.msra.gmra.mxu3 %v337_v29  ;;  %793 = vmatmul.bf16.vlgmr.msrb.gmra.mxu1 %v335_v15 }
 0x154   :  { %983 = vmatpush.bf16.msra.mxu1 %v1513_v34 }
 0x156   :  { %999 = vmatpush.bf16.msra.mxu2 %v1519_v47 }
 0x158   :  { %984 = vmatpush.bf16.msra.mxu1 %v1512_v36 }
 0x15a   :  { %1000 = vmatpush.bf16.msra.mxu2 %v1518_v51 }
 0x15c   :  { %985 = vmatpush.bf16.msra.mxu1 %v1511_v38 }
 0x15d   :  { %835 = vmatmul.bf16.vlgmr.msra.gmra.mxu0 %v338_v24  ;;  %v1540_v24 = vld [vmem:[#allocation11 + $0x7] ss:$0 sm:$0xff] }
 0x160   :  { %986 = vmatpush.bf16.msra.mxu1 %v1510_v40 }
 0x163   :  { %821 = vmatmul.bf16.vlgmr.msrb.gmra.mxu3 %v337_v29 }
 0x1c0   :  { %v738_v43 = vpop.f32.mrf.mxu1  ;;  %v752_v46 = vpop.f32.mrf.mxu2 }
 0x1c1   :  { %v739_v52 = vadd.f32 %v738_v43, %v405_v48 }
 0x1c3   :  { %v753_v55 = vadd.f32 %v752_v46, %v739_v52 }
 0x1c8   :  { %v740_v49 = vpop.f32.mrf.mxu1  ;;  %v754_v54 = vpop.f32.mrf.mxu2 }
 0x1c9   :  { %v741_v56 = vadd.f32 %v740_v49, %v405_v48 }
 0x1ca   :  { %v780_v50 = vpop.f32.mrf.mxu0 }
 0x1cb   :  { %v755_v60 = vadd.f32 %v754_v54, %v741_v56 }
 0x1d0   :  { %v794_v57 = vpop.f32.mrf.mxu1  ;;  %v808_v2 = vpop.f32.mrf.mxu2 }
 0x1d1   :  { %v795_v5 = vadd.f32 %v794_v57, %v406_v0 }
 0x1d2   :  { %v782_v59 = vpop.f32.mrf.mxu0 }
 0x1d3   :  { %v809_v10 = vadd.f32 %v808_v2, %v795_v5 }
 0x1d6   :  { %v766_v53 = vpop.f32.mrf.mxu3 }
 0x1d7   :  { %v767_v58 = vadd.f32 %v766_v53, %v753_v55 }
 0x1d8   :  { %v796_v6 = vpop.f32.mrf.mxu1  ;;  %v810_v13 = vpop.f32.mrf.mxu2 }
 0x1d9   :  { %v781_v62 = vadd.f32 %v780_v50, %v767_v58  ;;  %v797_v11 = vadd.f32 %v796_v6, %v406_v0 }
 0x1da   :  { %v836_v8 = vpop.f32.mrf.mxu0 }
 0x1db   :  { %v841_v3 = vmax.f32 %v781_v62, 0.0  ;;  %v811_v14 = vadd.f32 %v810_v13, %v797_v11 }
 0x1de   :  { %v768_v61 = vpop.f32.mrf.mxu3 }
 0x1df   :  { %v769_v63 = vadd.f32 %v768_v61, %v755_v60 }
 0x1e1   :  { %v783_v1 = vadd.f32 %v782_v59, %v769_v63 }
 0x1e2   :  { %v838_v18 = vpop.f32.mrf.mxu0 }
 0x1e3   :  { %v843_v4 = vmax.f32 %v783_v1, 0.0 }
 0x1e5   :  { %v845_v7 = vpack.c.bf16 %v843_v4, %v841_v3 }
 0x1e6   :  { %v822_v9 = vpop.f32.mrf.mxu3 }
 0x1e7   :  { %987 = vmatmul.bf16.vlgmr.msra.gmra.mxu1 %v845_v7  ;;  %v823_v12 = vadd.f32 %v822_v9, %v809_v10 }
 0x1e9   :  { %v837_v16 = vadd.f32 %v836_v8, %v823_v12 }
 0x1eb   :  { %v842_v20 = vmax.f32 %v837_v16, 0.0 }
 0x1ee   :  { %v824_v15 = vpop.f32.mrf.mxu3 }
 0x1ef   :  { %v825_v17 = vadd.f32 %v824_v15, %v811_v14 }
 0x1f1   :  { %v839_v19 = vadd.f32 %v838_v18, %v825_v17 }
 0x1f3   :  { %v844_v21 = vmax.f32 %v839_v19, 0.0 }
 0x1f5   :  { %v846_v22 = vpack.c.bf16 %v844_v21, %v842_v20 }
 0x1f7   :  { %1001 = vmatmul.bf16.vlgmr.msra.gmra.mxu2 %v846_v22 }
 0x264   :  { %v988_v23 = vpop.f32.mrf.mxu1 }
 0x265   :  { %v989_v25 = vadd.f32 %v1540_v24, %v988_v23 }
 0x26c   :  { %v990_v28 = vpop.f32.mrf.mxu1 }
 0x26d   :  { %v991_v29 = vadd.f32 %v1540_v24, %v990_v28 }
 0x27a   :  { %v1002_v26 = vpop.f32.mrf.mxu2 }
 0x27b   :  { %v1003_v27 = vadd.f32 %v1002_v26, %v989_v25 }
 0x27d   :  { %1007 = vst [vmem:[#allocation13] sm:$0xff] %v1003_v27 }
 0x282   :  { %v1004_v30 = vpop.f32.mrf.mxu2 }
 0x283   :  { %v1005_v31 = vadd.f32 %v1004_v30, %v991_v29 }
 0x285   :  { %1008 = vst [vmem:[#allocation13 + $0x8] sm:$0xff] %v1005_v31 }
 0x286   :  { %1021 = dma.vmem_to_hbm [thread:$0]  %s1014_s5, 256, %s1016_s7, [#allocation4], %s1723_s11, %s1723_s11, %s1724_s12  }
 0x287   :  { %1717 = dma.done.wait [#allocation4], 256  }
 0x288   :  { %1718 = vsyncadd [#allocation4], 4294967040 }
 0x289   :  { %1026 = vsyncpa [#allocation3], 1 }
 0x28a   :  { %1027 = vsyncpa [#allocation6], 1 }
 0x28b   :  { %1028 = vsyncpa [#allocation9], 1 }
 0x28c   :  { %1029 = vsyncpa [#allocation12], 1 }
 0x28d   :  { %1030 = vsyncpa [#allocation4], 1 }

</bundles_post_ra>
